<compile_context>
chip_gen: v7x
topology: tpu7x:2x2x1
jax: 0.10.0
libtpu: 0.0.40
codegen_flags: <defaults>
</compile_context>

<pallas_src>
import math

import numpy as np
import jax
import jax.numpy as jnp
from jax.experimental import pallas as pl
from jax.experimental.pallas import tpu as pltpu


def _round_up(a, b):
    return ((a + b - 1) // b) * b


def finetune_head_kernel(blk_ref, nkt_ref, batch_ref, x_ref,
                         w1_ref, b1_ref, w2_ref, b2_ref, w3_ref, b3_ref,
                         out_ref, acc_ref, cnt_ref):
    """grid = (graph_tiles, max node-tiles per graph tile).

    The node (reduction) axis only visits node tiles that can hold nodes of the
    current graph tile (scalar-prefetched block indices).  Segment sums/counts
    accumulate in f32 VMEM scratch; the 3-layer MLP runs once per graph tile in
    the last-step epilogue."""
    gi = pl.program_id(0)
    ni = pl.program_id(1)
    tile_g = acc_ref.shape[0]
    tile_n = x_ref.shape[0]

    @pl.when(ni == 0)
    def _init():
        acc_ref[...] = jnp.zeros_like(acc_ref)
        cnt_ref[...] = jnp.zeros_like(cnt_ref)

    # Skip trailing steps for graph tiles whose nodes span fewer node tiles than
    # the grid extent (their index_map clamps to the last valid block, so no
    # extra DMA happens and the compute must not be repeated).
    @pl.when(ni < nkt_ref[gi])
    def _accumulate():
        # Per-block one-hot (graph-row id vs node->graph assignment).
        row_gid = gi * tile_g + jax.lax.broadcasted_iota(
            jnp.int32, (tile_g, tile_n), 0)
        match = row_gid == batch_ref[...]                                  # [tg, tn]
        # Node counts: row-sum on the XLU slot (otherwise idle).
        cnt_ref[...] += jnp.sum(match.astype(jnp.float32), axis=-1, keepdims=True)
        # Per-graph feature sums: one bf16 MXU contraction, f32 accumulation.
        acc_ref[...] += jnp.dot(match.astype(jnp.bfloat16), x_ref[...],
                                preferred_element_type=jnp.float32)        # [tg, D]

    @pl.when(ni == pl.num_programs(1) - 1)
    def _finalize():
        counts = jnp.maximum(cnt_ref[...], 1.0)                # empty-row guard
        pooled = acc_ref[...] / counts                         # exact mean (f32)
        h = jnp.dot(pooled, w1_ref[...], preferred_element_type=jnp.float32) + b1_ref[...]
        h = jnp.maximum(h, 0.0)
        h = jnp.dot(h, w2_ref[...], preferred_element_type=jnp.float32) + b2_ref[...]
        h = jnp.maximum(h, 0.0)
        out_ref[...] = (jnp.dot(h, w3_ref[...], preferred_element_type=jnp.float32)
                        + b3_ref[...]).astype(out_ref.dtype)
        # TODO(synk): dim_out=1 makes this a 1-lane masked store; it only runs
        # once per graph tile so a lane-dense padded output slab is not worth
        # the extra wrapper slice here.


def pretrain_task_forward(x, batch_idx, y, num_graphs, params,
                          *, tile_n=None, tile_g=None):
    """Padding + block-skip schedule + pallas_call.  Returns (graph_rep, y).

    Requires batch_idx to be sorted (standard PyG batching) and concrete
    (the block-skip schedule is computed host-side with numpy)."""
    N, D = x.shape
    (w1, b1), (w2, b2), (w3, b3) = params
    dim_out = w3.shape[1]

    b_np = np.asarray(batch_idx, dtype=np.int32)
    assert b_np.shape == (N,)
    assert np.all(np.diff(b_np) >= 0), "batch_idx must be sorted (PyG batching)"

    # ---- node tiling: big blocks so per-step work >> ~600-cycle step overhead,
    #      sized so a double-buffered bf16 x block stays around <= 8 MiB. ----
    if tile_n is None:
        cap = min(4096, max(128, ((4 << 20) // (2 * D)) // 128 * 128))
        if N <= cap:
            tile_n = _round_up(max(N, 16), 16)       # single tile; bf16 sublane pack
        else:
            tile_n = cap                             # multiple of 128
    n_pad = _round_up(max(N, tile_n), tile_n)
    if tile_n < n_pad:
        assert tile_n % 128 == 0, "tiled node axis must be a multiple of 128"
    n_tiles = n_pad // tile_n

    # ---- graph tiling: >=2 tiles when num_graphs >= 16 (v7x megacore), cap 512 ----
    g_pad0 = _round_up(max(num_graphs, 8), 8)
    if tile_g is None:
        if num_graphs >= 16:
            tile_g = min(_round_up(-(-g_pad0 // 2), 8), 512)
        else:
            tile_g = g_pad0
    assert tile_g % 8 == 0
    g_pad = _round_up(g_pad0, tile_g)
    g_tiles = g_pad // tile_g

    # ---- block-skip schedule (host side): sorted batch_idx => each graph tile's
    #      nodes occupy a contiguous range of node tiles. ----
    gi_arr = np.arange(g_tiles)
    first = np.searchsorted(b_np, gi_arr * tile_g, side="left")
    last_ex = np.searchsorted(b_np, (gi_arr + 1) * tile_g, side="left")
    start_t = np.minimum(first // tile_n, n_tiles - 1)
    end_t = np.where(last_ex > first, (last_ex - 1) // tile_n + 1, start_t + 1)
    nkt = np.maximum(end_t - start_t, 1).astype(np.int32)        # tiles per graph tile
    max_kt = int(nkt.max())
    node_blk = np.minimum(start_t[:, None] + np.arange(max_kt)[None, :],
                          (start_t + nkt - 1)[:, None]).astype(np.int32).reshape(-1)

    # Pad node axis (zero features; batch id -1 never matches a graph row) and
    # cast x to bf16 — a single fused XLA pass, no ones-column concat anymore.
    x_p = jnp.pad(x, ((0, n_pad - N), (0, 0))).astype(jnp.bfloat16)
    batch_pad = np.full((1, n_pad), -1, dtype=np.int32)
    batch_pad[0, :N] = b_np
    batch_2d = jnp.asarray(batch_pad)

    def const_spec(shape):                  # tiny MLP weights stay VMEM-resident
        return pl.BlockSpec(shape, lambda gi, ni, blk, cnt: (0, 0))

    def batch_map(gi, ni, blk, cnt):
        return (0, blk[gi * max_kt + ni])

    def x_map(gi, ni, blk, cnt):
        return (blk[gi * max_kt + ni], 0)

    grid_spec = pltpu.PrefetchScalarGridSpec(
        num_scalar_prefetch=2,
        grid=(g_tiles, max_kt),
        in_specs=[
            pl.BlockSpec((1, tile_n), batch_map),        # node->graph ids
            pl.BlockSpec((tile_n, D), x_map),            # node features (bf16)
            const_spec(w1.shape), const_spec(b1.shape),
            const_spec(w2.shape), const_spec(b2.shape),
            const_spec(w3.shape), const_spec(b3.shape),
        ],
        out_specs=pl.BlockSpec((tile_g, dim_out), lambda gi, ni, blk, cnt: (gi, 0)),
        scratch_shapes=[pltpu.VMEM((tile_g, D), jnp.float32),    # feature sums
                        pltpu.VMEM((tile_g, 1), jnp.float32)],   # node counts
    )

    graph_rep = pl.pallas_call(
        finetune_head_kernel,
        out_shape=jax.ShapeDtypeStruct((g_pad, dim_out), jnp.float32),
        grid_spec=grid_spec,
        compiler_params=pltpu.CompilerParams(
            dimension_semantics=("parallel", "arbitrary"),
            vmem_limit_bytes=48 * 1024 * 1024),   # safe on v5e/v6e (128 MiB) & v7x (64 MiB)
    )(jnp.asarray(node_blk), jnp.asarray(nkt), batch_2d, x_p,
      w1, b1, w2, b2, w3, b3)

    return graph_rep[:num_graphs], y


def _reference(x, batch_idx, num_graphs, params):
    """Pure-JAX reference of the same forward (bf16 features, like the kernel)."""
    xb = x.astype(jnp.bfloat16).astype(jnp.float32)
    onehot = (jnp.arange(num_graphs)[:, None] == batch_idx[None, :]).astype(jnp.float32)
    counts = jnp.maximum(onehot.sum(-1, keepdims=True), 1.0)
    pooled = (onehot @ xb) / counts
    h = pooled
    for i, (w, b) in enumerate(params):
        h = h @ w + b
        if i < len(params) - 1:
            h = jnp.maximum(h, 0.0)
    return h


if __name__ == "__main__":
    key = jax.random.PRNGKey(0)
    dim_in, dim_out, L = 32, 1, 2          # PretrainTask(dim_in=32, dim_out=1, L=2)

    keys = jax.random.split(key, 2 + 2 * (L + 1))
    # ba_layers dims: 32 -> 16 -> 8 -> 1  (dim_in // 2**l, last layer to dim_out)
    dims = [dim_in // (2 ** l) for l in range(L + 1)] + [dim_out]
    params = []
    for i in range(L + 1):
        fan_in, fan_out = dims[i], dims[i + 1]
        bound = 1.0 / math.sqrt(fan_in)     # deterministic, nn.Linear-style init
        w = jax.random.uniform(keys[2 + 2 * i], (fan_in, fan_out),
                               dtype=jnp.float32, minval=-bound, maxval=bound)
        b = jax.random.uniform(keys[3 + 2 * i], (1, fan_out),
                               dtype=jnp.float32, minval=-bound, maxval=bound)
        params.append((w, b))

    # ---- test 1: tiny batch (2 graphs, 16 nodes) -> single-tile path ----
    num_nodes, num_graphs = 16, 2
    x = jax.random.normal(keys[0], (num_nodes, dim_in), dtype=jnp.float32)
    y = jax.random.normal(keys[1], (num_graphs, dim_out), dtype=jnp.float32)
    batch_idx = jnp.array([0] * 9 + [1] * 7, dtype=jnp.int32)   # sorted (PyG batching)

    graph_rep, y_out = pretrain_task_forward(x, batch_idx, y, num_graphs, params)
    jax.block_until_ready(graph_rep)
    ref = _reference(x, batch_idx, num_graphs, params)
    assert graph_rep.shape == (num_graphs, dim_out), graph_rep.shape
    assert jnp.allclose(graph_rep, ref, atol=1e-2, rtol=1e-2), (graph_rep, ref)
    assert jnp.array_equal(y_out, y)

    # ---- test 2: multi-tile path exercising the scalar-prefetch block skipping
    # (3 graph tiles x max 2 node tiles instead of a dense 3 x 3 sweep) ----
    num_nodes2, num_graphs2 = 600, 40
    x2 = jax.random.normal(jax.random.PRNGKey(1), (num_nodes2, dim_in), dtype=jnp.float32)
    y2 = jax.random.normal(jax.random.PRNGKey(2), (num_graphs2, dim_out), dtype=jnp.float32)
    batch_idx2 = jnp.repeat(jnp.arange(num_graphs2, dtype=jnp.int32),
                            num_nodes2 // num_graphs2)

    graph_rep2, _ = pretrain_task_forward(x2, batch_idx2, y2, num_graphs2, params,
                                          tile_n=256, tile_g=16)
    jax.block_until_ready(graph_rep2)
    ref2 = _reference(x2, batch_idx2, num_graphs2, params)
    assert graph_rep2.shape == (num_graphs2, dim_out), graph_rep2.shape
    assert jnp.allclose(graph_rep2, ref2, atol=1e-2, rtol=1e-2), (graph_rep2, ref2)

    print("KERNEL_OK")
</pallas_src>

<mosaic_0001>
module attributes {stable_mosaic.version = 11 : i64} {
  func.func @finetune_head_kernel(%arg0: i32, %arg1: i32, %arg2: memref<1xi32, #tpu.memory_space<smem>>, %arg3: memref<1xi32, #tpu.memory_space<smem>>, %arg4: memref<1x16xi32, #tpu.memory_space<vmem>>, %arg5: memref<16x32xbf16, #tpu.memory_space<vmem>>, %arg6: memref<32x16xf32, #tpu.memory_space<vmem>>, %arg7: memref<1x16xf32, #tpu.memory_space<vmem>>, %arg8: memref<16x8xf32, #tpu.memory_space<vmem>>, %arg9: memref<1x8xf32, #tpu.memory_space<vmem>>, %arg10: memref<8x1xf32, #tpu.memory_space<vmem>>, %arg11: memref<1x1xf32, #tpu.memory_space<vmem>>, %arg12: memref<8x1xf32, #tpu.memory_space<vmem>>, %arg13: memref<8x32xf32, #tpu.memory_space<vmem>>, %arg14: memref<8x1xf32, #tpu.memory_space<vmem>>) attributes {dimension_semantics = [#tpu.dimension_semantics<parallel>, #tpu.dimension_semantics<arbitrary>], iteration_bounds = array<i64: 1, 1>, scalar_prefetch = 2 : i64, scratch_operands = 2 : i64, tpu.core_type = #tpu.core_type<tc>, window_params = [{transform_indices = @transform_0, window_bounds = array<i64: 1, 16>}, {transform_indices = @transform_1, window_bounds = array<i64: 16, 32>}, {pipeline_mode = #tpu.pipeline_mode<synchronous>, transform_indices = @transform_2, window_bounds = array<i64: 32, 16>}, {pipeline_mode = #tpu.pipeline_mode<synchronous>, transform_indices = @transform_3, window_bounds = array<i64: 1, 16>}, {pipeline_mode = #tpu.pipeline_mode<synchronous>, transform_indices = @transform_4, window_bounds = array<i64: 16, 8>}, {pipeline_mode = #tpu.pipeline_mode<synchronous>, transform_indices = @transform_5, window_bounds = array<i64: 1, 8>}, {pipeline_mode = #tpu.pipeline_mode<synchronous>, transform_indices = @transform_6, window_bounds = array<i64: 8, 1>}, {pipeline_mode = #tpu.pipeline_mode<synchronous>, transform_indices = @transform_7, window_bounds = array<i64: 1, 1>}, {transform_indices = @transform_8, window_bounds = array<i64: 8, 1>}]} {
    %c0_i32 = arith.constant 0 : i32
    %0 = arith.cmpi eq, %arg1, %c0_i32 : i32
    %1 = arith.extui %0 : i1 to i32
    %c0_i32_0 = arith.constant 0 : i32
    %2 = arith.cmpi ne, %1, %c0_i32_0 : i32
    scf.if %2 {
      %cst = arith.constant 0.000000e+00 : f32
      %11 = vector.broadcast %cst : f32 to vector<8x32xf32>
      %c0 = arith.constant 0 : index
      %c0_4 = arith.constant 0 : index
      %12 = vector.load %arg13[%c0, %c0_4] : memref<8x32xf32, #tpu.memory_space<vmem>>, vector<8x32xf32>
      tpu.vector_store %arg13[%c0, %c0_4], %11 {strides = array<i32>} : memref<8x32xf32, #tpu.memory_space<vmem>>, vector<8x32xf32>,
      %cst_5 = arith.constant 0.000000e+00 : f32
      %13 = vector.broadcast %cst_5 : f32 to vector<8x1xf32>
      %c0_6 = arith.constant 0 : index
      %c0_7 = arith.constant 0 : index
      %14 = vector.load %arg14[%c0_6, %c0_7] : memref<8x1xf32, #tpu.memory_space<vmem>>, vector<8x1xf32>
      tpu.vector_store %arg14[%c0_6, %c0_7], %13 {strides = array<i32>} : memref<8x1xf32, #tpu.memory_space<vmem>>, vector<8x1xf32>,
    } else {
    }
    %3 = arith.index_cast %arg0 : i32 to index
    %4 = memref.load %arg3[%3] : memref<1xi32, #tpu.memory_space<smem>>
    %5 = arith.cmpi slt, %arg1, %4 : i32
    %6 = arith.extui %5 : i1 to i32
    %c0_i32_1 = arith.constant 0 : i32
    %7 = arith.cmpi ne, %6, %c0_i32_1 : i32
    scf.if %7 {
      %c8_i32 = arith.constant 8 : i32
      %11 = arith.muli %arg0, %c8_i32 : i32
      %12 = tpu.iota {dimensions = array<i32: 0>} : vector<8x16xi32>
      %13 = vector.broadcast %11 : i32 to vector<8x16xi32>
      %14 = arith.addi %13, %12 : vector<8x16xi32>
      %c0 = arith.constant 0 : index
      %c0_4 = arith.constant 0 : index
      %15 = vector.load %arg4[%c0, %c0_4] : memref<1x16xi32, #tpu.memory_space<vmem>>, vector<1x16xi32>
      %16 = vector.broadcast %15 : vector<1x16xi32> to vector<8x16xi32>
      %17 = arith.cmpi eq, %14, %16 : vector<8x16xi32>
      %c0_5 = arith.constant 0 : index
      %c0_6 = arith.constant 0 : index
      %18 = vector.load %arg14[%c0_5, %c0_6] : memref<8x1xf32, #tpu.memory_space<vmem>>, vector<8x1xf32>
      %19 = arith.extui %17 : vector<8x16xi1> to vector<8x16xi32>
      %20 = arith.sitofp %19 : vector<8x16xi32> to vector<8x16xf32>
      %cst = arith.constant dense<0.000000e+00> : vector<8xf32>
      %21 = vector.multi_reduction <add>, %20, %cst [1] : vector<8x16xf32> to vector<8xf32>
      %22 = vector.shape_cast %21 : vector<8xf32> to vector<8x1xf32>
      %23 = arith.addf %18, %22 : vector<8x1xf32>
      %c0_7 = arith.constant 0 : index
      %c0_8 = arith.constant 0 : index
      %24 = vector.load %arg14[%c0_7, %c0_8] : memref<8x1xf32, #tpu.memory_space<vmem>>, vector<8x1xf32>
      tpu.vector_store %arg14[%c0_7, %c0_8], %23 {strides = array<i32>} : memref<8x1xf32, #tpu.memory_space<vmem>>, vector<8x1xf32>,
      %c0_9 = arith.constant 0 : index
      %c0_10 = arith.constant 0 : index
      %25 = vector.load %arg13[%c0_9, %c0_10] : memref<8x32xf32, #tpu.memory_space<vmem>>, vector<8x32xf32>
      %26 = arith.extui %17 : vector<8x16xi1> to vector<8x16xi32>
      %27 = arith.sitofp %26 : vector<8x16xi32> to vector<8x16xf32>
      %28 = arith.truncf %27 : vector<8x16xf32> to vector<8x16xbf16>
      %c0_11 = arith.constant 0 : index
      %c0_12 = arith.constant 0 : index
      %29 = vector.load %arg5[%c0_11, %c0_12] : memref<16x32xbf16, #tpu.memory_space<vmem>>, vector<16x32xbf16>
      %cst_13 = arith.constant dense<0.000000e+00> : vector<8x32xf32>
      %30 = tpu.matmul %28, %29, %cst_13 {dimension_numbers = #tpu.dot_dimension_numbers<[1], [0], [0], [1], [0, 0, 1, 1], [], []>} : vector<8x16xbf16>, vector<16x32xbf16>, vector<8x32xf32> -> vector<8x32xf32>
      %31 = arith.addf %25, %30 : vector<8x32xf32>
      %c0_14 = arith.constant 0 : index
      %c0_15 = arith.constant 0 : index
      %32 = vector.load %arg13[%c0_14, %c0_15] : memref<8x32xf32, #tpu.memory_space<vmem>>, vector<8x32xf32>
      tpu.vector_store %arg13[%c0_14, %c0_15], %31 {strides = array<i32>} : memref<8x32xf32, #tpu.memory_space<vmem>>, vector<8x32xf32>,
    } else {
    }
    %c0_i32_2 = arith.constant 0 : i32
    %8 = arith.cmpi eq, %arg1, %c0_i32_2 : i32
    %9 = arith.extui %8 : i1 to i32
    %c0_i32_3 = arith.constant 0 : i32
    %10 = arith.cmpi ne, %9, %c0_i32_3 : i32
    scf.if %10 {
      %c0 = arith.constant 0 : index
      %c0_4 = arith.constant 0 : index
      %11 = vector.load %arg14[%c0, %c0_4] : memref<8x1xf32, #tpu.memory_space<vmem>>, vector<8x1xf32>
      %cst = arith.constant 1.000000e+00 : f32
      %12 = vector.broadcast %cst : f32 to vector<8x1xf32>
      %13 = arith.maximumf %11, %12 : vector<8x1xf32>
      %c0_5 = arith.constant 0 : index
      %c0_6 = arith.constant 0 : index
      %14 = vector.load %arg13[%c0_5, %c0_6] : memref<8x32xf32, #tpu.memory_space<vmem>>, vector<8x32xf32>
      %15 = vector.broadcast %13 : vector<8x1xf32> to vector<8x32xf32>
      %16 = arith.divf %14, %15 : vector<8x32xf32>
      %c0_7 = arith.constant 0 : index
      %c0_8 = arith.constant 0 : index
      %17 = vector.load %arg6[%c0_7, %c0_8] : memref<32x16xf32, #tpu.memory_space<vmem>>, vector<32x16xf32>
      %cst_9 = arith.constant dense<0.000000e+00> : vector<8x16xf32>
      %18 = tpu.matmul %16, %17, %cst_9 {dimension_numbers = #tpu.dot_dimension_numbers<[1], [0], [0], [1], [0, 0, 1, 1], [], []>} : vector<8x32xf32>, vector<32x16xf32>, vector<8x16xf32> -> vector<8x16xf32>
      %c0_10 = arith.constant 0 : index
      %c0_11 = arith.constant 0 : index
      %19 = vector.load %arg7[%c0_10, %c0_11] : memref<1x16xf32, #tpu.memory_space<vmem>>, vector<1x16xf32>
      %20 = vector.broadcast %19 : vector<1x16xf32> to vector<8x16xf32>
      %21 = arith.addf %18, %20 : vector<8x16xf32>
      %cst_12 = arith.constant 0.000000e+00 : f32
      %22 = vector.broadcast %cst_12 : f32 to vector<8x16xf32>
      %23 = arith.maximumf %21, %22 : vector<8x16xf32>
      %c0_13 = arith.constant 0 : index
      %c0_14 = arith.constant 0 : index
      %24 = vector.load %arg8[%c0_13, %c0_14] : memref<16x8xf32, #tpu.memory_space<vmem>>, vector<16x8xf32>
      %cst_15 = arith.constant dense<0.000000e+00> : vector<8x8xf32>
      %25 = tpu.matmul %23, %24, %cst_15 {dimension_numbers = #tpu.dot_dimension_numbers<[1], [0], [0], [1], [0, 0, 1, 1], [], []>} : vector<8x16xf32>, vector<16x8xf32>, vector<8x8xf32> -> vector<8x8xf32>
      %c0_16 = arith.constant 0 : index
      %c0_17 = arith.constant 0 : index
      %26 = vector.load %arg9[%c0_16, %c0_17] : memref<1x8xf32, #tpu.memory_space<vmem>>, vector<1x8xf32>
      %27 = vector.broadcast %26 : vector<1x8xf32> to vector<8x8xf32>
      %28 = arith.addf %25, %27 : vector<8x8xf32>
      %cst_18 = arith.constant 0.000000e+00 : f32
      %29 = vector.broadcast %cst_18 : f32 to vector<8x8xf32>
      %30 = arith.maximumf %28, %29 : vector<8x8xf32>
      %c0_19 = arith.constant 0 : index
      %c0_20 = arith.constant 0 : index
      %31 = vector.load %arg10[%c0_19, %c0_20] : memref<8x1xf32, #tpu.memory_space<vmem>>, vector<8x1xf32>
      %cst_21 = arith.constant dense<0.000000e+00> : vector<8x1xf32>
      %32 = tpu.matmul %30, %31, %cst_21 {dimension_numbers = #tpu.dot_dimension_numbers<[1], [0], [0], [1], [0, 0, 1, 1], [], []>} : vector<8x8xf32>, vector<8x1xf32>, vector<8x1xf32> -> vector<8x1xf32>
      %c0_22 = arith.constant 0 : index
      %c0_23 = arith.constant 0 : index
      %33 = vector.load %arg11[%c0_22, %c0_23] : memref<1x1xf32, #tpu.memory_space<vmem>>, vector<1x1xf32>
      %34 = vector.broadcast %33 : vector<1x1xf32> to vector<8x1xf32>
      %35 = arith.addf %32, %34 : vector<8x1xf32>
      %c0_24 = arith.constant 0 : index
      %c0_25 = arith.constant 0 : index
      %36 = vector.load %arg12[%c0_24, %c0_25] : memref<8x1xf32, #tpu.memory_space<vmem>>, vector<8x1xf32>
      tpu.vector_store %arg12[%c0_24, %c0_25], %35 {strides = array<i32>} : memref<8x1xf32, #tpu.memory_space<vmem>>, vector<8x1xf32>,
    } else {
    }
    return
  }
  func.func @transform_0(%arg0: i32, %arg1: i32, %arg2: memref<1xi32, #tpu.memory_space<smem>>, %arg3: memref<1xi32, #tpu.memory_space<smem>>) -> (i32, i32) {
    %c1_i32 = arith.constant 1 : i32
    %0 = arith.muli %arg0, %c1_i32 : i32
    %1 = arith.addi %0, %arg1 : i32
    %2 = arith.index_cast %1 : i32 to index
    %3 = memref.load %arg2[%2] : memref<1xi32, #tpu.memory_space<smem>>
    %c0_i32 = arith.constant 0 : i32
    %c0_i32_0 = arith.constant 0 : i32
    return %c0_i32, %3 : i32, i32
  }
  func.func @transform_1(%arg0: i32, %arg1: i32, %arg2: memref<1xi32, #tpu.memory_space<smem>>, %arg3: memref<1xi32, #tpu.memory_space<smem>>) -> (i32, i32) {
    %c1_i32 = arith.constant 1 : i32
    %0 = arith.muli %arg0, %c1_i32 : i32
    %1 = arith.addi %0, %arg1 : i32
    %2 = arith.index_cast %1 : i32 to index
    %3 = memref.load %arg2[%2] : memref<1xi32, #tpu.memory_space<smem>>
    %c0_i32 = arith.constant 0 : i32
    %c0_i32_0 = arith.constant 0 : i32
    return %3, %c0_i32 : i32, i32
  }
  func.func @transform_2(%arg0: i32, %arg1: i32, %arg2: memref<1xi32, #tpu.memory_space<smem>>, %arg3: memref<1xi32, #tpu.memory_space<smem>>) -> (i32, i32) {
    %c0_i32 = arith.constant 0 : i32
    %c0_i32_0 = arith.constant 0 : i32
    %c0_i32_1 = arith.constant 0 : i32
    return %c0_i32, %c0_i32_0 : i32, i32
  }
  func.func @transform_3(%arg0: i32, %arg1: i32, %arg2: memref<1xi32, #tpu.memory_space<smem>>, %arg3: memref<1xi32, #tpu.memory_space<smem>>) -> (i32, i32) {
    %c0_i32 = arith.constant 0 : i32
    %c0_i32_0 = arith.constant 0 : i32
    %c0_i32_1 = arith.constant 0 : i32
    return %c0_i32, %c0_i32_0 : i32, i32
  }
  func.func @transform_4(%arg0: i32, %arg1: i32, %arg2: memref<1xi32, #tpu.memory_space<smem>>, %arg3: memref<1xi32, #tpu.memory_space<smem>>) -> (i32, i32) {
    %c0_i32 = arith.constant 0 : i32
    %c0_i32_0 = arith.constant 0 : i32
    %c0_i32_1 = arith.constant 0 : i32
    return %c0_i32, %c0_i32_0 : i32, i32
  }
  func.func @transform_5(%arg0: i32, %arg1: i32, %arg2: memref<1xi32, #tpu.memory_space<smem>>, %arg3: memref<1xi32, #tpu.memory_space<smem>>) -> (i32, i32) {
    %c0_i32 = arith.constant 0 : i32
    %c0_i32_0 = arith.constant 0 : i32
    %c0_i32_1 = arith.constant 0 : i32
    return %c0_i32, %c0_i32_0 : i32, i32
  }
  func.func @transform_6(%arg0: i32, %arg1: i32, %arg2: memref<1xi32, #tpu.memory_space<smem>>, %arg3: memref<1xi32, #tpu.memory_space<smem>>) -> (i32, i32) {
    %c0_i32 = arith.constant 0 : i32
    %c0_i32_0 = arith.constant 0 : i32
    %c0_i32_1 = arith.constant 0 : i32
    return %c0_i32, %c0_i32_0 : i32, i32
  }
  func.func @transform_7(%arg0: i32, %arg1: i32, %arg2: memref<1xi32, #tpu.memory_space<smem>>, %arg3: memref<1xi32, #tpu.memory_space<smem>>) -> (i32, i32) {
    %c0_i32 = arith.constant 0 : i32
    %c0_i32_0 = arith.constant 0 : i32
    %c0_i32_1 = arith.constant 0 : i32
    return %c0_i32, %c0_i32_0 : i32, i32
  }
  func.func @transform_8(%arg0: i32, %arg1: i32, %arg2: memref<1xi32, #tpu.memory_space<smem>>, %arg3: memref<1xi32, #tpu.memory_space<smem>>) -> (i32, i32) {
    %c0_i32 = arith.constant 0 : i32
    %c0_i32_0 = arith.constant 0 : i32
    return %arg0, %c0_i32 : i32, i32
  }
}

</mosaic_0001>

<bundles_post_ra>
// kernel: tpu_custom_call.1
= control target key start
LH: loop header
LB: loop body
LE: loop exit
PB: predicated region body
PF: predicated region fallthrough
CT: control target
= control target key end

     0   :  { %vm86_vm0 = vcmask 261120   ;;  %vm88_vm1 = vcmask 7168   ;;  %v526_v1 = vmov 0.0   ;;  %s653_s0 = inlined_call_operand.<no memory space> [shape: s32[1], index: 0, kind: input, shape index: {}]   ;;  %s654_s1 = inlined_call_operand.<no memory space> [shape: s32[1], index: 1, kind: input, shape index: {}]   ;;  %s655_s4 = inlined_call_operand.vmem [shape: f32[32,16], index: 4, kind: input, shape index: {}]   ;;  %s656_s5 = inlined_call_operand.vmem [shape: f32[1,16], index: 5, kind: input, shape index: {}]   ;;  %s657_s6 = inlined_call_operand.vmem [shape: f32[16,8], index: 6, kind: input, shape index: {}]   ;;  %s658_s7 = inlined_call_operand.vmem [shape: f32[1,8], index: 7, kind: input, shape index: {}]   ;;  %s659_s8 = inlined_call_operand.vmem [shape: f32[8,1], index: 8, kind: input, shape index: {}]   ;;  %s660_s9 = inlined_call_operand.<no memory space> [shape: f32[1,1], index: 9, kind: input, shape index: {}]   ;;  %s661_s10 = inlined_call_operand.vmem [shape: f32[8,1], index: 10, kind: output, shape index: {}]   ;;  %s662_s2 = inlined_call_operand.vmem [shape: s32[1,16], index: 2, kind: input, shape index: {}]   ;;  %s663_s3 = inlined_call_operand.vmem [shape: bf16[16,32], index: 3, kind: input, shape index: {}]  }
   0x1   :  { %v17_v0 = vstv %s660_s9  ;;  %p66_p0 = scmp.lt.s32.totalorder %s653_s0, 0  ;;  %s452_s19 = sshll.u32 %s653_s0, 1  ;;  %87 = vst.msk [vmem:[#allocation2] sm:$0xff] %vm86_vm0, %v526_v1 }
   0x2   :  { %89 = vst.msk [vmem:[#allocation3] sm:$0xff] %vm88_vm1, %v526_v1  ;;  %18 = vst [vmem:[#allocation7] sm:$0x1] %v17_v0  ;;  %p74_p1 = scmp.lt.s32.totalorder %s452_s19, 1  ;;  %p455_p2 = scmp.le.s32.totalorder %s654_s1, 0 }
   0x3   :  { %s665_s0 = smov (!%p66_p0, %s653_s0), 0  ;;  %v96_v2 = vlaneseq (!%p455_p2)  ;;  %v527_v5 = vmov (!%p455_p2), 0.0   ;;  %vm528_vm2 = vmmov (!%p455_p2), 0   ;;  %vm109_vm4 = vcmask (!%p455_p2), 130048  }
   0x4   :  { %s667_s19 = smov (!%p74_p1, %s452_s19), 1  ;;  %s68_s23 = scalar_lea.vmem %s662_s2, %s665_s0  ;;  %478 = vmatprep.subr.bf16.mxu0 (!%p455_p2), %v527_v5  ;;  %480 = vmatprep.mubr.msk.bf16.mxu0 (!%p455_p2), %vm528_vm2, %v527_v5 }
   0x5   :  { %s453_s24 = sshll.u32 %s667_s19, 2  ;;  %94 = sbr.rel (%p455_p2) target bundleno = 226 (0xe2), region = 41  ;;  %v456_v4 = vld [vmem:[%s68_s23] ss:$0 sm:$0xff] (!%p455_p2)  ;;  %v97_v6 = vshrl.u32 (!%p455_p2), %v96_v2, 7 }
   0x6   :  { %s77_s27 = scalar_lea.vmem %s663_s3, %s453_s24 }
   0x7   :  { %v522_v3 = vld [vmem:[%s77_s27] sm:$0xff] (!%p455_p2)   ;;  %vm105_vm3 = vcmp.eq.s32.totalorder (!%p455_p2), %v97_v6, %v456_v4 }
   0x8   :  { %479 = vmatpush3.bf16.msra.mxu0 (!%p455_p2), %v522_v3  ;;  %v457_v7 = vsel (!%p455_p2), %vm105_vm3, 1.0, %v527_v5  ;;  %v116_v13 = vld [vmem:[#allocation2] sm:$0xff] (!%p455_p2) }
   0x9   :  { %v117_v8 = vpack.c.bf16 (!%p455_p2), %v457_v7, %v457_v7  ;;  %v110_v9 = vsel (!%p455_p2), %vm109_vm4, %v457_v7, 0.0  ;;  %v106_v10 = vld [vmem:[#allocation3] sm:$0xff] (!%p455_p2) }
   0xa   :  { %111 = vadd.xlane.f32.xlu0 (!%p455_p2), %v110_v9 }
   0xb   :  { %481 = vmatmul.mubr.msk.bf16.vlgmr.msra.gmra.mrb[0].mxu0 (!%p455_p2), %vm109_vm4, %v117_v8 }
  0x97   :  { %v112_v11 = vpop.xlane.xlu0 %111 }
  0x98   :  { %v113_v12 = vadd.f32 %v112_v11, %v106_v10 }
  0x9a   :  { %115 = vst.msk [vmem:[#allocation3] sm:$0xff] %vm88_vm1, %v113_v12 }
  0xde   :  { %v163_v14 = vpop.f32.mrb[0].mxu0 }
  0xdf   :  { %v169_v15 = vadd.f32 %v163_v14, %v116_v13  ;;  %v482_v16 = vpop.f32.mrb[1].mxu0 }
  0xe0   :  { %v166_v17 = vpop.f32.mrb[2].mxu0 }
  0xe1   :  { %171 = vst.msk [vmem:[#allocation2] sm:$0xff] %vm86_vm0, %v169_v15  ;;  %v483_v18 = vpop.f32.mrb[3].mxu0 }
  0xe2 PF:  { %v175_v19 = vld [vmem:[#allocation3] sm:$0xff]  ;;  %v529_v20 = vmov 0   ;;  %v185_v22 = vld [vmem:[%s655_s4] sm:$0xff]  ;;  %v187_v24 = vld [vmem:[%s655_s4 + $0x10] sm:$0xff]  ;;  %v530_v25 = vmov 0.0|0.0   ;;  %vm531_vm5 = vmmov 0  }
  0xe3   :  { %523 = vset.pattern.permute.xlu0 %v529_v20  ;;  %v176_v21 = vmax.f32 %v175_v19, 1.0  ;;  %v186_v23 = vld [vmem:[%s655_s4 + $0x8] sm:$0xff]  ;;  %507 = vmatprep.subr.bf16.mxu0 %v530_v25  ;;  %v188_v27 = vld [vmem:[%s655_s4 + $0x18] sm:$0xff]  ;;  %v271_v33 = vld [vmem:[%s657_s6] sm:$0xff]  ;;  %vm280_vm6 = vcmask 130048   ;;  %vm363_vm7 = vcmask 64512  }
  0xe4   :  { %v508_v26 = vpack.c.bf16 %v186_v23, %v185_v22  ;;  %492 = vmatprep.mubr.msk.f32.mxu0 %vm531_vm5, %v526_v1  ;;  %513 = vmatprep.subr.bf16.mxu1 %v530_v25  ;;  %v511_v28 = vpack.c.bf16 %v188_v27, %v187_v24  ;;  %v272_v34 = vld [vmem:[%s657_s6 + $0x8] sm:$0xff]  ;;  %v460_v36 = vld [vmem:[%s656_s5] ss:$0 sm:$0xff]  ;;  %v464_v47 = vld [vmem:[#allocation7] ss:$0 sm:$0xff] }
  0xe5   :  { %180 = vperm.xlu0 %523, %v176_v21   ;;  %499 = vmatprep.mubr.msk.f32.mxu1 %vm531_vm5, %v526_v1  ;;  %v514_v35 = vpack.c.bf16 %v272_v34, %v271_v33  ;;  %v355_v41 = vld [vmem:[%s659_s8] sm:$0xff] }
  0xe6   :  { %509 = vmatpush3.bf16.msra.mxu0 %v508_v26  ;;  %v462_v42 = vld [vmem:[%s658_s7] ss:$0 sm:$0xff] }
  0xe7   :  { %510 = vmatprep.subr.bf16.mxu0 %v530_v25  ;;  %515 = vmatpush3.bf16.msra.mxu1 %v514_v35 }
  0xe8   :  { %v177_v30 = vld [vmem:[#allocation2] sm:$0xff]  ;;  %502 = vmatprep.subr.mxu1 %v526_v1 }
  0xea   :  { %512 = vmatpush3.bf16.msra.mxu0 %v511_v28 }
 0x164   :  { %v181_v29 = vpop.permute.xlu0 %180 }
 0x165   :  { %524 = vrcp.f32 %v181_v29 }
 0x16f   :  { %v525_v31 = vpop.eup %524 }
 0x170   :  { %v184_v32 = vmul.f32 %v525_v31, %v177_v30 }
 0x172   :  { %493 = vmatmul.mubr.msk.f32.vlgmr.msra.gmra.mrb[0].mxu0 %vm86_vm0, %v184_v32 }
 0x245   :  { %v266_v37 = vpop.f32.mrb[0].mxu0 }
 0x246   :  { %v267_v38 = vadd.f32 %v460_v36, %v266_v37  ;;  %v494_v39 = vpop.f32.mrb[1].mxu0 }
 0x248   :  { %v270_v40 = vmax.f32 %v267_v38, 0.0 }
 0x24a   :  { %500 = vmatmul.mubr.msk.f32.vlgmr.msra.gmra.mrb[0].mxu1 %vm280_vm6, %v270_v40 }
 0x24b   :  { %504 = vmatprep.mubr.msk.f32.mxu1 %vm531_vm5, %v526_v1  ;;  %503 = vmatpush3.msra.mxu1 %v355_v41 }
 0x31d   :  { %v350_v43 = vpop.f32.mrb[0].mxu1 }
 0x31e   :  { %v351_v44 = vadd.f32 %v462_v42, %v350_v43  ;;  %v501_v45 = vpop.f32.mrb[1].mxu1 }
 0x320   :  { %v354_v46 = vmax.f32 %v351_v44, 0.0 }
 0x322   :  { %505 = vmatmul.mubr.msk.f32.vlgmr.msra.gmra.mrb[2].mxu1 %vm363_vm7, %v354_v46 }
 0x3f5   :  { %v433_v48 = vpop.f32.mrb[2].mxu1 }
 0x3f6   :  { %v434_v49 = vadd.f32 %v464_v47, %v433_v48  ;;  %v506_v50 = vpop.f32.mrb[3].mxu1 }
 0x3f8   :  { %438 = vst.msk [vmem:[%s661_s10] sm:$0xff] %vm88_vm1, %v434_v49 }

</bundles_post_ra>
